<compile_context>
chip_gen: v6e
topology: v6e:2x2x1
jax: 0.10.0
libtpu: 0.0.40
codegen_flags: <defaults>
</compile_context>

<pallas_src>
import functools

import jax
import jax.numpy as jnp
from jax.experimental import pallas as pl
from jax.experimental.pallas import tpu as pltpu


def _view_mlp_kernel(x_ref, w1_ref, b1_ref, w2_ref, b2_ref, o_ref, *,
                     compute_dtype):
    # x_ref : (B, C, fv_dim)     one view's features, natural layout
    # w1_ref: (fv_dim, bv_dim)   b1_ref: (1, bv_dim)
    # w2_ref: (bv_dim, bv_dim)   b2_ref: (1, bv_dim)
    # o_ref : (B, C, bv_dim)
    w1 = w1_ref[...]
    w2 = w2_ref[...]
    b1 = b1_ref[...].astype(jnp.float32)
    b2 = b2_ref[...].astype(jnp.float32)
    if compute_dtype is not None:
        w1 = w1.astype(compute_dtype)
        w2 = w2.astype(compute_dtype)

    n_batch = x_ref.shape[0]
    for b in range(n_batch):   # static unroll over the (small) batch dim
        x = x_ref[b]
        if compute_dtype is not None:
            x = x.astype(compute_dtype)
        h = jnp.dot(x, w1, preferred_element_type=jnp.float32) + b1
        h = jnp.maximum(h, 0.0)                       # ReLU (f32)
        if compute_dtype is not None:
            h = h.astype(compute_dtype)
        y = jnp.dot(h, w2, preferred_element_type=jnp.float32) + b2
        y = jnp.maximum(y, 0.0)                       # ReLU (f32)
        o_ref[b] = y.astype(o_ref.dtype)              # lane-dense (C, bv) store


@functools.partial(jax.jit, static_argnames=("bv_size", "compute_dtype"))
def view_transformation(feat, w1, b1, w2, b2, *, bv_size,
                        compute_dtype=jnp.bfloat16):
    """feat: [B, N, C, H, W]; per-view weights stored as (in_dim, out_dim):
       w1: [N, fv_dim, bv_dim], b1: [N, bv_dim]
       w2: [N, bv_dim, bv_dim], b2: [N, bv_dim]
    Returns [B, N, C, bv_h, bv_w]. compute_dtype=None -> exact f32 matmuls."""
    B, N, C, H, W = feat.shape
    fv_dim = H * W
    bv_h, bv_w = bv_size
    bv_dim = bv_h * bv_w

    # Free reshape (trailing dims contiguous) — no HBM transpose.
    x = feat.reshape(B, N, C, fv_dim)

    if compute_dtype is not None:
        w1 = w1.astype(compute_dtype)
        w2 = w2.astype(compute_dtype)
    b1r = b1.reshape(N, 1, bv_dim).astype(jnp.float32)
    b2r = b2.reshape(N, 1, bv_dim).astype(jnp.float32)

    kernel = functools.partial(_view_mlp_kernel, compute_dtype=compute_dtype)

    flops = 2 * B * N * C * (fv_dim * bv_dim + bv_dim * bv_dim)
    bytes_accessed = int(
        B * N * C * fv_dim * x.dtype.itemsize          # feat in
        + N * fv_dim * bv_dim * w1.dtype.itemsize      # w1
        + N * bv_dim * bv_dim * w2.dtype.itemsize      # w2
        + 2 * N * bv_dim * 4                           # biases
        + B * N * C * bv_dim * feat.dtype.itemsize)    # out

    out = pl.pallas_call(
        kernel,
        out_shape=jax.ShapeDtypeStruct((B, N, C, bv_dim), feat.dtype),
        grid_spec=pltpu.PrefetchScalarGridSpec(
            num_scalar_prefetch=0,
            grid=(N,),
            in_specs=[
                # Full (B, C) slab of one view; view dim squeezed.
                pl.BlockSpec((B, None, C, fv_dim), lambda n: (0, n, 0, 0)),
                pl.BlockSpec((None, fv_dim, bv_dim), lambda n: (n, 0, 0)),
                pl.BlockSpec((None, 1, bv_dim), lambda n: (n, 0, 0)),
                pl.BlockSpec((None, bv_dim, bv_dim), lambda n: (n, 0, 0)),
                pl.BlockSpec((None, 1, bv_dim), lambda n: (n, 0, 0)),
            ],
            out_specs=pl.BlockSpec((B, None, C, bv_dim), lambda n: (0, n, 0, 0)),
        ),
        compiler_params=pltpu.CompilerParams(
            dimension_semantics=("parallel",)),
        cost_estimate=pl.CostEstimate(
            flops=flops, transcendentals=0, bytes_accessed=bytes_accessed),
    )(x, w1, b1r, w2, b2r)

    # Free reshape back to the BEV grid.
    return out.reshape(B, N, C, bv_h, bv_w)


def _reference(feat, w1, b1, w2, b2, bv_size):
    B, N, C, H, W = feat.shape
    x = feat.reshape(B, N, C, H * W)
    outs = []
    for i in range(N):
        h = jnp.maximum(x[:, i] @ w1[i] + b1[i], 0.0)
        y = jnp.maximum(h @ w2[i] + b2[i], 0.0)
        outs.append(y.reshape(B, C, bv_size[0], bv_size[1]))
    return jnp.stack(outs, axis=1)


if __name__ == "__main__":
    # Small shapes consistent with the module.
    B, n_views, C = 2, 6, 4
    fv_size = (8, 16)     # H, W  -> fv_dim = 128
    bv_size = (8, 16)     # -> bv_dim = 128
    H, W = fv_size
    fv_dim = H * W
    bv_dim = bv_size[0] * bv_size[1]

    key = jax.random.PRNGKey(0)
    k_feat, k_w1, k_b1, k_w2, k_b2 = jax.random.split(key, 5)

    feat = jax.random.normal(k_feat, (B, n_views, C, H, W), dtype=jnp.float32)

    # Deterministic parameter init (PyTorch-Linear-style uniform bounds),
    # stored as (in_dim, out_dim) per view.
    bound1 = 1.0 / jnp.sqrt(fv_dim)
    bound2 = 1.0 / jnp.sqrt(bv_dim)
    w1 = jax.random.uniform(k_w1, (n_views, fv_dim, bv_dim),
                            minval=-bound1, maxval=bound1, dtype=jnp.float32)
    b1 = jax.random.uniform(k_b1, (n_views, bv_dim),
                            minval=-bound1, maxval=bound1, dtype=jnp.float32)
    w2 = jax.random.uniform(k_w2, (n_views, bv_dim, bv_dim),
                            minval=-bound2, maxval=bound2, dtype=jnp.float32)
    b2 = jax.random.uniform(k_b2, (n_views, bv_dim),
                            minval=-bound2, maxval=bound2, dtype=jnp.float32)

    ref = _reference(feat, w1, b1, w2, b2, bv_size)

    # Exact f32 path: must match the reference tightly.
    out_f32 = view_transformation(feat, w1, b1, w2, b2, bv_size=bv_size,
                                  compute_dtype=None)
    out_f32 = jax.block_until_ready(out_f32)
    assert out_f32.shape == (B, n_views, C, bv_size[0], bv_size[1]), out_f32.shape
    assert jnp.allclose(out_f32, ref, atol=1e-5, rtol=1e-5), "f32 mismatch"

    # Default bf16-matmul path (f32 accumulation): within bf16 tolerance.
    out_bf16 = view_transformation(feat, w1, b1, w2, b2, bv_size=bv_size)
    out_bf16 = jax.block_until_ready(out_bf16)
    assert out_bf16.shape == (B, n_views, C, bv_size[0], bv_size[1]), out_bf16.shape
    assert jnp.allclose(out_bf16, ref, atol=5e-2, rtol=5e-2), "bf16 mismatch"

    print("KERNEL_OK")
</pallas_src>

<mosaic_0001>
module attributes {stable_mosaic.version = 11 : i64} {
  func.func @_view_mlp_kernel(%arg0: i32, %arg1: memref<2x1x4x128xf32, #tpu.memory_space<vmem>>, %arg2: memref<1x128x128xf32, #tpu.memory_space<vmem>>, %arg3: memref<1x1x128xf32, #tpu.memory_space<vmem>>, %arg4: memref<1x128x128xf32, #tpu.memory_space<vmem>>, %arg5: memref<1x1x128xf32, #tpu.memory_space<vmem>>, %arg6: memref<2x1x4x128xf32, #tpu.memory_space<vmem>>) attributes {dimension_semantics = [#tpu.dimension_semantics<parallel>], iteration_bounds = array<i64: 6>, scalar_prefetch = 0 : i64, scratch_operands = 0 : i64, tpu.core_type = #tpu.core_type<tc>, window_params = [{transform_indices = @transform_0, window_bounds = array<i64: 2, 1, 4, 128>}, {transform_indices = @transform_1, window_bounds = array<i64: 1, 128, 128>}, {transform_indices = @transform_2, window_bounds = array<i64: 1, 1, 128>}, {transform_indices = @transform_3, window_bounds = array<i64: 1, 128, 128>}, {transform_indices = @transform_4, window_bounds = array<i64: 1, 1, 128>}, {transform_indices = @transform_5, window_bounds = array<i64: 2, 1, 4, 128>}]} {
    %c0 = arith.constant 0 : index
    %c0_0 = arith.constant 0 : index
    %c0_1 = arith.constant 0 : index
    %0 = vector.load %arg2[%c0, %c0_0, %c0_1] : memref<1x128x128xf32, #tpu.memory_space<vmem>>, vector<1x128x128xf32>
    %1 = vector.shape_cast %0 : vector<1x128x128xf32> to vector<128x128xf32>
    %c0_2 = arith.constant 0 : index
    %c0_3 = arith.constant 0 : index
    %c0_4 = arith.constant 0 : index
    %2 = vector.load %arg4[%c0_2, %c0_3, %c0_4] : memref<1x128x128xf32, #tpu.memory_space<vmem>>, vector<1x128x128xf32>
    %3 = vector.shape_cast %2 : vector<1x128x128xf32> to vector<128x128xf32>
    %c0_5 = arith.constant 0 : index
    %c0_6 = arith.constant 0 : index
    %c0_7 = arith.constant 0 : index
    %4 = vector.load %arg3[%c0_5, %c0_6, %c0_7] : memref<1x1x128xf32, #tpu.memory_space<vmem>>, vector<1x1x128xf32>
    %5 = vector.shape_cast %4 : vector<1x1x128xf32> to vector<1x128xf32>
    %c0_8 = arith.constant 0 : index
    %c0_9 = arith.constant 0 : index
    %c0_10 = arith.constant 0 : index
    %6 = vector.load %arg5[%c0_8, %c0_9, %c0_10] : memref<1x1x128xf32, #tpu.memory_space<vmem>>, vector<1x1x128xf32>
    %7 = vector.shape_cast %6 : vector<1x1x128xf32> to vector<1x128xf32>
    %c0_11 = arith.constant 0 : index
    %c0_12 = arith.constant 0 : index
    %c0_13 = arith.constant 0 : index
    %c0_14 = arith.constant 0 : index
    %8 = vector.load %arg1[%c0_11, %c0_12, %c0_13, %c0_14] : memref<2x1x4x128xf32, #tpu.memory_space<vmem>>, vector<1x1x4x128xf32>
    %9 = vector.shape_cast %8 : vector<1x1x4x128xf32> to vector<4x128xf32>
    %cst = arith.constant dense<0.000000e+00> : vector<4x128xf32>
    %10 = tpu.matmul %9, %1, %cst {dimension_numbers = #tpu.dot_dimension_numbers<[1], [0], [0], [1], [0, 0, 1, 1], [], []>} : vector<4x128xf32>, vector<128x128xf32>, vector<4x128xf32> -> vector<4x128xf32>
    %11 = vector.broadcast %5 : vector<1x128xf32> to vector<4x128xf32>
    %12 = arith.addf %10, %11 : vector<4x128xf32>
    %cst_15 = arith.constant 0.000000e+00 : f32
    %13 = vector.broadcast %cst_15 : f32 to vector<4x128xf32>
    %14 = arith.maximumf %12, %13 : vector<4x128xf32>
    %cst_16 = arith.constant dense<0.000000e+00> : vector<4x128xf32>
    %15 = tpu.matmul %14, %3, %cst_16 {dimension_numbers = #tpu.dot_dimension_numbers<[1], [0], [0], [1], [0, 0, 1, 1], [], []>} : vector<4x128xf32>, vector<128x128xf32>, vector<4x128xf32> -> vector<4x128xf32>
    %16 = vector.broadcast %7 : vector<1x128xf32> to vector<4x128xf32>
    %17 = arith.addf %15, %16 : vector<4x128xf32>
    %cst_17 = arith.constant 0.000000e+00 : f32
    %18 = vector.broadcast %cst_17 : f32 to vector<4x128xf32>
    %19 = arith.maximumf %17, %18 : vector<4x128xf32>
    %c0_18 = arith.constant 0 : index
    %c0_19 = arith.constant 0 : index
    %c0_20 = arith.constant 0 : index
    %c0_21 = arith.constant 0 : index
    %20 = vector.load %arg6[%c0_18, %c0_19, %c0_20, %c0_21] : memref<2x1x4x128xf32, #tpu.memory_space<vmem>>, vector<1x1x4x128xf32>
    %21 = vector.shape_cast %20 : vector<1x1x4x128xf32> to vector<4x128xf32>
    %22 = vector.shape_cast %19 : vector<4x128xf32> to vector<1x1x4x128xf32>
    tpu.vector_store %arg6[%c0_18, %c0_19, %c0_20, %c0_21], %22 {strides = array<i32>} : memref<2x1x4x128xf32, #tpu.memory_space<vmem>>, vector<1x1x4x128xf32>,
    %c1 = arith.constant 1 : index
    %c0_22 = arith.constant 0 : index
    %c0_23 = arith.constant 0 : index
    %c0_24 = arith.constant 0 : index
    %23 = vector.load %arg1[%c1, %c0_22, %c0_23, %c0_24] : memref<2x1x4x128xf32, #tpu.memory_space<vmem>>, vector<1x1x4x128xf32>
    %24 = vector.shape_cast %23 : vector<1x1x4x128xf32> to vector<4x128xf32>
    %cst_25 = arith.constant dense<0.000000e+00> : vector<4x128xf32>
    %25 = tpu.matmul %24, %1, %cst_25 {dimension_numbers = #tpu.dot_dimension_numbers<[1], [0], [0], [1], [0, 0, 1, 1], [], []>} : vector<4x128xf32>, vector<128x128xf32>, vector<4x128xf32> -> vector<4x128xf32>
    %26 = vector.broadcast %5 : vector<1x128xf32> to vector<4x128xf32>
    %27 = arith.addf %25, %26 : vector<4x128xf32>
    %cst_26 = arith.constant 0.000000e+00 : f32
    %28 = vector.broadcast %cst_26 : f32 to vector<4x128xf32>
    %29 = arith.maximumf %27, %28 : vector<4x128xf32>
    %cst_27 = arith.constant dense<0.000000e+00> : vector<4x128xf32>
    %30 = tpu.matmul %29, %3, %cst_27 {dimension_numbers = #tpu.dot_dimension_numbers<[1], [0], [0], [1], [0, 0, 1, 1], [], []>} : vector<4x128xf32>, vector<128x128xf32>, vector<4x128xf32> -> vector<4x128xf32>
    %31 = vector.broadcast %7 : vector<1x128xf32> to vector<4x128xf32>
    %32 = arith.addf %30, %31 : vector<4x128xf32>
    %cst_28 = arith.constant 0.000000e+00 : f32
    %33 = vector.broadcast %cst_28 : f32 to vector<4x128xf32>
    %34 = arith.maximumf %32, %33 : vector<4x128xf32>
    %c1_29 = arith.constant 1 : index
    %c0_30 = arith.constant 0 : index
    %c0_31 = arith.constant 0 : index
    %c0_32 = arith.constant 0 : index
    %35 = vector.load %arg6[%c1_29, %c0_30, %c0_31, %c0_32] : memref<2x1x4x128xf32, #tpu.memory_space<vmem>>, vector<1x1x4x128xf32>
    %36 = vector.shape_cast %35 : vector<1x1x4x128xf32> to vector<4x128xf32>
    %37 = vector.shape_cast %34 : vector<4x128xf32> to vector<1x1x4x128xf32>
    tpu.vector_store %arg6[%c1_29, %c0_30, %c0_31, %c0_32], %37 {strides = array<i32>} : memref<2x1x4x128xf32, #tpu.memory_space<vmem>>, vector<1x1x4x128xf32>,
    return
  }
  func.func @transform_0(%arg0: i32) -> (i32, i32, i32, i32) {
    %c0_i32 = arith.constant 0 : i32
    %c0_i32_0 = arith.constant 0 : i32
    %c0_i32_1 = arith.constant 0 : i32
    %c0_i32_2 = arith.constant 0 : i32
    return %c0_i32, %arg0, %c0_i32_0, %c0_i32_1 : i32, i32, i32, i32
  }
  func.func @transform_1(%arg0: i32) -> (i32, i32, i32) {
    %c0_i32 = arith.constant 0 : i32
    %c0_i32_0 = arith.constant 0 : i32
    %c0_i32_1 = arith.constant 0 : i32
    return %arg0, %c0_i32, %c0_i32_0 : i32, i32, i32
  }
  func.func @transform_2(%arg0: i32) -> (i32, i32, i32) {
    %c0_i32 = arith.constant 0 : i32
    %c0_i32_0 = arith.constant 0 : i32
    %c0_i32_1 = arith.constant 0 : i32
    return %arg0, %c0_i32, %c0_i32_0 : i32, i32, i32
  }
  func.func @transform_3(%arg0: i32) -> (i32, i32, i32) {
    %c0_i32 = arith.constant 0 : i32
    %c0_i32_0 = arith.constant 0 : i32
    %c0_i32_1 = arith.constant 0 : i32
    return %arg0, %c0_i32, %c0_i32_0 : i32, i32, i32
  }
  func.func @transform_4(%arg0: i32) -> (i32, i32, i32) {
    %c0_i32 = arith.constant 0 : i32
    %c0_i32_0 = arith.constant 0 : i32
    %c0_i32_1 = arith.constant 0 : i32
    return %arg0, %c0_i32, %c0_i32_0 : i32, i32, i32
  }
  func.func @transform_5(%arg0: i32) -> (i32, i32, i32, i32) {
    %c0_i32 = arith.constant 0 : i32
    %c0_i32_0 = arith.constant 0 : i32
    %c0_i32_1 = arith.constant 0 : i32
    %c0_i32_2 = arith.constant 0 : i32
    return %c0_i32, %arg0, %c0_i32_0, %c0_i32_1 : i32, i32, i32, i32
  }
}

</mosaic_0001>

<bundles_post_ra>
// kernel: view_transformation.1
= control target key start
LH: loop header
LB: loop body
LE: loop exit
PB: predicated region body
PF: predicated region fallthrough
CT: control target
= control target key end

     0   :  { %10 = vsyncpa [#allocation4], 0  ;;  %s1680_s0 = inlined_call_operand.vmem [shape: f32[2,6,4,128], index: 0, kind: input, shape index: {}]   ;;  %s1681_s1 = inlined_call_operand.hbm [shape: f32[6,128,128], index: 1, kind: input, shape index: {}]   ;;  %s1682_s2 = inlined_call_operand.vmem [shape: f32[6,1,128], index: 2, kind: input, shape index: {}]   ;;  %s1683_s3 = inlined_call_operand.hbm [shape: f32[6,128,128], index: 3, kind: input, shape index: {}]   ;;  %s1684_s4 = inlined_call_operand.vmem [shape: f32[6,1,128], index: 4, kind: input, shape index: {}]   ;;  %s1685_s5 = inlined_call_operand.vmem [shape: f32[2,6,4,128], index: 5, kind: output, shape index: {}]  }
   0x1   :  { %12 = vsyncpa [#allocation4 + $0x1], 0 }
   0x2   :  { %13 = vsyncpa [#allocation6], 0 }
   0x3   :  { %15 = vsyncpa [#allocation6 + $0x1], 0  ;;  %s1287_s18 = smov 0   ;;  %s1289_s19 = smov 0  }
   0x4   :  { %s1291_s20 = smov 0   ;;  %s1293_s21 = smov 0  }
   0x5 LB: > { %s1306_s22 = sadd.s32 4294967295, %s1249_s21   ;;  %s1309_s23 = sadd.s32 1, %s1249_s21   ;;  %s1249_s21 = sphi %s1293_s21, %s1693_s21   ;;  %s1245_s20 = sphi %s1291_s20, %s1692_s20   ;;  %s1241_s19 = sphi %s1289_s19, %s1691_s19   ;;  %s1237_s18 = sphi %s1287_s18, %s1690_s18  }
   0x6   : > { %s25_s24 = ssub.s32 %s1249_s21, %s1309_s23  ;;  %s28_s25 = sadd.s32 1, %s1245_s20 }
   0x7   : > { %p26_p0 = scmp.eq.s32.totalorder %s25_s24, 0  ;;  %p35_p1 = scmp.ne.s32.totalorder %s1245_s20, %s1241_s19 }
   0x8   : > { %p36_p2 = scmp.eq.s32.totalorder %s1249_s21, 0  ;;  %p67_p3 = scmp.ne.s32.totalorder %s1241_s19, %s1237_s18 }
   0x9   : > { %s1319_s26 = scalar_select %p26_p0, %s1245_s20, %s28_s25  }
   0xa   : > { %p1321_p4 = por %p36_p2, %p35_p1  ;;  %p68_p5 = scmp.eq.s32.totalorder %s1306_s22, 0 }
   0xb   : > { %p169_p6 = scmp.eq.s32.totalorder %s1306_s22, 5  ;;  %p887_p9 = scmp.ge.s32.totalorder %s1249_s21, 6 }
   0xc   : > { %p1327_p7 = por %p68_p5, %p67_p3 }
   0xd   : > { %p1331_p8 = por %p169_p6, %p35_p1  ;;  %191 = sbr.rel (%p887_p9) target bundleno = 71 (0x47), region = 16 }
   0xf   : > { %s1688_s29 = scalar_select %p1331_p8, 1, 0 }
  0x12   : > { %194 = sbr.rel (!%p1321_p4) target bundleno = 23 (0x17), region = 20  ;;  %s196_s30 = sand.u32 (%p1321_p4), 1, %s1245_s20  }
  0x13   : > { %s889_s6 = sshll.u32 (%p1321_p4), %s1249_s21, 2  ;;  %s888_s7 = sshll.u32 (%p1321_p4), %s196_s30, 3 }
  0x14   : > { %s200_s10 = scalar_lea.vmem (%p1321_p4), %s1680_s0, %s889_s6  ;;  %s198_s11 = scalar_lea.vmem (%p1321_p4), [#allocation2], %s888_s7 }
  0x15   : > { %v217_v0 = vld [vmem:[%s200_s10] sm:$0xf] (%p1321_p4)  ;;  %v219_v1 = vld [vmem:[%s200_s10 + $0x18] sm:$0xf] (%p1321_p4) }
  0x16   : > { %218 = vst [vmem:[%s198_s11] sm:$0xf] (%p1321_p4), %v217_v0  ;;  %220 = vst [vmem:[%s198_s11 + $0x4] sm:$0xf] (%p1321_p4), %v219_v1 }
  0x17 PF: > { %s1344_s12 = sand.u32 1, %s1245_s20   ;;  %s909_s13 = sshll.u32 %s1249_s21, 11 }
  0x18   : > { %s890_s14 = sshll.u32 %s1344_s12, 7  ;;  %s1353_s17 = scalar_lea.hbm %s1681_s1, %s909_s13 }
  0x19   : > { %s253_s18 = scalar_lea.vmem [#allocation3], %s890_s14  ;;  %s250_s25 = scalar_lea.sflag [#allocation4], %s1344_s12 }
  0x1a   : > { %s260_s24 = sshll.u32 %s253_s18, 4  ;;  %s1159_s30 = scalar_lea.hbm %s1353_s17, 2048  ;;  %s1357_s24 = int_to_ptr.vmem [resolvable:$true] %s260_s24 }
  0x1b   : > { %p1160_p10 = scmp.ne.s32.totalorder %s1353_s17, %s1159_s30  ;;  %s1163_s8 = scalar_lea.hbm %s1681_s1, 12288 }
  0x1c   : > { %p1164_p13 = scmp.lt.s32.totalorder %s1353_s17, %s1681_s1  ;;  %p1165_p0 = scmp.lt.s32.totalorder %s1163_s8, %s1159_s30 }
  0x1d   : > { %p1161_p11 = pnand %p1160_p10, %p1321_p4 }
  0x1e   : > { %p1166_p1 = por %p1165_p0, %p1164_p13 }
  0x1f   : > { %p1162_p12 = pneg %p1161_p11 }
  0x21   : > { %p1167_p2 = pnand %p1166_p1, %p1162_p12 }
  0x23   : > { %1170 = shalt.err (!%p1167_p2)
}
  0x24   : > { %s1171_s11 = scalar_lea.vmem %s1357_s24, 2048  ;;  %s1251_s15 = smov [#allocation3]  }
  0x25   : > { %p1172_p3 = scmp.ne.s32.totalorder %s1357_s24, %s1171_s11  ;;  %s1175_s16 = sshll.u32 %s1251_s15, 4  ;;  %s1176_s16 = int_to_ptr.vmem [resolvable:$false] %s1175_s16 }
  0x26   : > { %s1177_s18 = scalar_lea.vmem %s1176_s16, 4096  ;;  %p1178_p9 = scmp.lt.s32.totalorder %s1357_s24, %s1176_s16 }
  0x27   : > { %p1173_p5 = pnand %p1172_p3, %p1321_p4  ;;  %p1179_p10 = scmp.lt.s32.totalorder %s1177_s18, %s1171_s11 }
  0x29   : > { %p1174_p6 = pneg %p1173_p5  ;;  %p1180_p11 = por %p1179_p10, %p1178_p9 }
  0x2b   : > { %p1181_p8 = pnand %p1180_p11, %p1174_p6 }
  0x2d   : > { %1184 = shalt.err (!%p1181_p8)
}
  0x2e   : > { %s1252_s30 = smov 128   ;;  %s1253_s6 = smov 8  }
  0x2f   : > { %1119 = dma.hbm_to_vmem [thread:$0]  (%p1321_p4), %s1353_s17, 2048, %s1357_s24, %s250_s25, %s1252_s30, %s1252_s30, %s1253_s6  }
  0x30   : > { %s1390_s9 = scalar_lea.hbm %s1683_s3, %s909_s13  ;;  %s280_s10 = scalar_lea.vmem [#allocation5], %s890_s14 }
  0x31   : > { %s287_s11 = sshll.u32 %s280_s10, 4  ;;  %s277_s15 = scalar_lea.sflag [#allocation6], %s1344_s12  ;;  %s1394_s11 = int_to_ptr.vmem [resolvable:$true] %s287_s11 }
  0x32   : > { %s1185_s16 = scalar_lea.hbm %s1390_s9, 2048  ;;  %s1189_s25 = scalar_lea.hbm %s1683_s3, 12288 }
  0x33   : > { %p1186_p8 = scmp.ne.s32.totalorder %s1390_s9, %s1185_s16  ;;  %p1190_p0 = scmp.lt.s32.totalorder %s1390_s9, %s1683_s3 }
  0x34   : > { %p1191_p1 = scmp.lt.s32.totalorder %s1189_s25, %s1185_s16 }
  0x35   : > { %p1187_p12 = pnand %p1186_p8, %p1321_p4 }
  0x36   : > { %p1192_p2 = por %p1191_p1, %p1190_p0 }
  0x37   : > { %p1188_p13 = pneg %p1187_p12 }
  0x39   : > { %p1193_p3 = pnand %p1192_p2, %p1188_p13 }
  0x3b   : > { %1196 = shalt.err (!%p1193_p3)
}
  0x3c   : > { %s1197_s12 = scalar_lea.vmem %s1394_s11, 2048  ;;  %s1254_s14 = smov [#allocation5]  }
  0x3d   : > { %p1198_p5 = scmp.ne.s32.totalorder %s1394_s11, %s1197_s12  ;;  %s1201_s7 = sshll.u32 %s1254_s14, 4  ;;  %s1202_s7 = int_to_ptr.vmem [resolvable:$false] %s1201_s7 }
  0x3e   : > { %s1203_s8 = scalar_lea.vmem %s1202_s7, 4096  ;;  %p1204_p10 = scmp.lt.s32.totalorder %s1394_s11, %s1202_s7 }
  0x3f   : > { %p1199_p6 = pnand %p1198_p5, %p1321_p4  ;;  %p1205_p11 = scmp.lt.s32.totalorder %s1203_s8, %s1197_s12 }
  0x41   : > { %p1200_p9 = pneg %p1199_p6  ;;  %p1206_p8 = por %p1205_p11, %p1204_p10 }
  0x43   : > { %p1207_p12 = pnand %p1206_p8, %p1200_p9 }
  0x45   : > { %1210 = shalt.err (!%p1207_p12)
}
  0x46   : > { %1120 = dma.hbm_to_vmem [thread:$0]  (%p1321_p4), %s1390_s9, 2048, %s1394_s11, %s277_s15, %s1252_s30, %s1252_s30, %s1253_s6  }
  0x47 PF: > { %p896_p13 = scmp.ge.s32.totalorder %s1249_s21, 1  ;;  %p301_p0 = scmp.lt.s32.totalorder %s1249_s21, 7 }
  0x49   : > { %p302_p1 = pnand %p896_p13, %p301_p0 }
  0x4a   : > { %s1423_s10 = sand.u32 (!%p302_p1), 1, %s1241_s19  }
  0x4b   : > { %305 = sbr.rel (%p302_p1) target bundleno = 552 (0x228), region = 77  ;;  %s897_s27 = sshll.u32 (!%p302_p1), %s1423_s10, 3 }
  0x4c   : > { %s898_s16 = sshll.u32 (!%p302_p1), %s1423_s10, 7  ;;  %s1429_s17 = scalar_lea.vmem (!%p302_p1), [#allocation2], %s897_s27 }
  0x4d   : > { %s315_s30 = scalar_lea.sflag (!%p302_p1), [#allocation4], %s1423_s10  ;;  %s1432_s6 = scalar_lea.vmem (!%p302_p1), [#allocation3], %s898_s16 }
  0x50   : > { %1228 = dma.done.wait (%p1327_p7), %s315_s30, 2048  }
  0x51   : > { %1230 = vsyncadd (%p1327_p7), %s315_s30, 4294965248  ;;  %s324_s21 = scalar_lea.sflag [#allocation6], %s1423_s10  ;;  %s1439_s9 = scalar_lea.vmem [#allocation5], %s898_s16 }
  0x52   : > { %1232 = dma.done.wait (%p1327_p7), %s324_s21, 2048  }
  0x53   : > { %1234 = vsyncadd (%p1327_p7), %s324_s21, 4294965248  ;;  %v1255_v2 = vmov 0.0   ;;  %vm1256_vm0 = vmmov 0   ;;  %v1452_v3 = vld [vmem:[%s1432_s6 + $0x78] sm:$0xff]  ;;  %v1455_v4 = vld [vmem:[%s1432_s6 + $0x70] sm:$0xff]  ;;  %p368_p4 = scmp.lt.s32.totalorder %s1306_s22, 5 }
  0x54   : > { %979 = vmatprep.subr.mxu0 %v1255_v2  ;;  %1011 = vmatprep.mubr.msk.f32.mxu0 %vm1256_vm0, %v1255_v2  ;;  %v1460_v5 = vld [vmem:[%s1432_s6 + $0x68] sm:$0xff]  ;;  %v1465_v6 = vld [vmem:[%s1432_s6 + $0x60] sm:$0xff]  ;;  %v1470_v7 = vld [vmem:[%s1432_s6 + $0x58] sm:$0xff]  ;;  %s367_s12 = scalar_lea.vmem [#allocation7], %s897_s27  ;;  %p1689_p7 = scmp.ne.s32.totalorder %s1688_s29, 0 }
  0x55   : > { %1014 = vmatprep.subr.mxu1 %v1255_v2  ;;  %1046 = vmatprep.mubr.msk.f32.mxu1 %vm1256_vm0, %v1255_v2  ;;  %v1473_v8 = vld [vmem:[%s1439_s9 + $0x78] sm:$0xff]  ;;  %v1476_v9 = vld [vmem:[%s1439_s9 + $0x70] sm:$0xff]  ;;  %v1486_v11 = vld [vmem:[%s1439_s9 + $0x68] sm:$0xff]  ;;  %s1619_s28 = scalar_select %p368_p4, %s1306_s22, 5 }
  0x56   : > { %980 = vmatpush3.msra.mxu0 %v1452_v3  ;;  %1015 = vmatpush3.msra.mxu1 %v1473_v8  ;;  %v1482_v10 = vld [vmem:[%s1432_s6 + $0x50] sm:$0xff]  ;;  %v1492_v12 = vld [vmem:[%s1432_s6 + $0x48] sm:$0xff]  ;;  %v1496_v13 = vld [vmem:[%s1439_s9 + $0x60] sm:$0xff]  ;;  %s906_s14 = sshll.u32 (%p1689_p7), %s1306_s22, 2 }
  0x57   : > { %981 = vmatprep.subr.mxu0 %v1255_v2  ;;  %1016 = vmatprep.subr.mxu1 %v1255_v2  ;;  %v1502_v14 = vld [vmem:[%s1432_s6 + $0x40] sm:$0xff]  ;;  %v1506_v15 = vld [vmem:[%s1439_s9 + $0x58] sm:$0xff]  ;;  %v1516_v17 = vld [vmem:[%s1439_s9 + $0x50] sm:$0xff]  ;;  %s370_s24 = scalar_lea.vmem %s1682_s2, %s1619_s28  ;;  %s373_s18 = scalar_lea.vmem %s1684_s4, %s1619_s28 }
  0x58   : > { %982 = vmatpush3.msra.mxu0 %v1455_v4  ;;  %1017 = vmatpush3.msra.mxu1 %v1476_v9  ;;  %v1512_v16 = vld [vmem:[%s1432_s6 + $0x38] sm:$0xff]  ;;  %v1522_v18 = vld [vmem:[%s1432_s6 + $0x30] sm:$0xff]  ;;  %v1526_v19 = vld [vmem:[%s1439_s9 + $0x48] sm:$0xff]  ;;  %s718_s16 = scalar_lea.vmem (%p1689_p7), %s1685_s5, %s906_s14 }
  0x59   : > { %983 = vmatprep.subr.mxu0 %v1255_v2  ;;  %1018 = vmatprep.subr.mxu1 %v1255_v2  ;;  %v1532_v20 = vld [vmem:[%s1432_s6 + $0x28] sm:$0xff]  ;;  %v1536_v21 = vld [vmem:[%s1439_s9 + $0x40] sm:$0xff]  ;;  %v1544_v23 = vld [vmem:[%s1439_s9 + $0x38] sm:$0xff] }
  0x5a   : > { %984 = vmatpush3.msra.mxu0 %v1460_v5  ;;  %1019 = vmatpush3.msra.mxu1 %v1486_v11  ;;  %v378_v22 = vld [vmem:[%s1432_s6 + $0x20] sm:$0xff]  ;;  %v377_v24 = vld [vmem:[%s1432_s6 + $0x18] sm:$0xff]  ;;  %v1552_v25 = vld [vmem:[%s1439_s9 + $0x30] sm:$0xff] }
  0x5b   : > { %985 = vmatprep.subr.mxu0 %v1255_v2  ;;  %1020 = vmatprep.subr.mxu1 %v1255_v2  ;;  %v376_v26 = vld [vmem:[%s1432_s6 + $0x10] sm:$0xff]  ;;  %v1559_v27 = vld [vmem:[%s1439_s9 + $0x28] sm:$0xff]  ;;  %v1566_v29 = vld [vmem:[%s1439_s9 + $0x20] sm:$0xff] }
  0x5c   : > { %986 = vmatpush3.msra.mxu0 %v1465_v6  ;;  %1021 = vmatpush3.msra.mxu1 %v1496_v13  ;;  %v375_v28 = vld [vmem:[%s1432_s6 + $0x8] sm:$0xff]  ;;  %v374_v30 = vld [vmem:[%s1432_s6] sm:$0xff]  ;;  %v1573_v31 = vld [vmem:[%s1439_s9 + $0x18] sm:$0xff] }
  0x5d   : > { %987 = vmatprep.subr.mxu0 %v1255_v2  ;;  %1022 = vmatprep.subr.mxu1 %v1255_v2  ;;  %v408_v32 = vld [vmem:[%s1429_s17] sm:$0xf]  ;;  %v903_v33 = vld [vmem:[%s1429_s17 + $0x4] sm:$0xf]  ;;  %v391_v35 = vld [vmem:[%s1439_s9 + $0x8] sm:$0xff] }
  0x5e   : > { %988 = vmatpush3.msra.mxu0 %v1470_v7  ;;  %1023 = vmatpush3.msra.mxu1 %v1506_v15  ;;  %v392_v34 = vld [vmem:[%s1439_s9 + $0x10] sm:$0xff]  ;;  %v390_v36 = vld [vmem:[%s1439_s9] sm:$0xff] }
  0x5f   : > { %989 = vmatprep.subr.mxu0 %v1255_v2  ;;  %1024 = vmatprep.subr.mxu1 %v1255_v2  ;;  %v901_v37 = vld [vmem:[%s370_s24] ss:$0 sm:$0xff] }
  0x60   : > { %990 = vmatpush3.msra.mxu0 %v1482_v10  ;;  %1025 = vmatpush3.msra.mxu1 %v1516_v17  ;;  %v902_v46 = vld [vmem:[%s373_s18] ss:$0 sm:$0xff] }
  0x61   : > { %991 = vmatprep.subr.mxu0 %v1255_v2  ;;  %1026 = vmatprep.subr.mxu1 %v1255_v2 }
  0x62   : > { %992 = vmatpush3.msra.mxu0 %v1492_v12  ;;  %1027 = vmatpush3.msra.mxu1 %v1526_v19 }
  0x63   : > { %993 = vmatprep.subr.mxu0 %v1255_v2  ;;  %1028 = vmatprep.subr.mxu1 %v1255_v2 }
  0x64   : > { %994 = vmatpush3.msra.mxu0 %v1502_v14  ;;  %1029 = vmatpush3.msra.mxu1 %v1536_v21 }
  0x65   : > { %995 = vmatprep.subr.mxu0 %v1255_v2  ;;  %1030 = vmatprep.subr.mxu1 %v1255_v2 }
  0x66   : > { %996 = vmatpush3.msra.mxu0 %v1512_v16  ;;  %1031 = vmatpush3.msra.mxu1 %v1544_v23 }
  0x67   : > { %997 = vmatprep.subr.mxu0 %v1255_v2  ;;  %1032 = vmatprep.subr.mxu1 %v1255_v2 }
  0x68   : > { %998 = vmatpush3.msra.mxu0 %v1522_v18  ;;  %1033 = vmatpush3.msra.mxu1 %v1552_v25 }
  0x69   : > { %999 = vmatprep.subr.mxu0 %v1255_v2  ;;  %1034 = vmatprep.subr.mxu1 %v1255_v2 }
  0x6a   : > { %1000 = vmatpush3.msra.mxu0 %v1532_v20  ;;  %1035 = vmatpush3.msra.mxu1 %v1559_v27 }
  0x6b   : > { %1001 = vmatprep.subr.mxu0 %v1255_v2  ;;  %1036 = vmatprep.subr.mxu1 %v1255_v2 }
  0x6c   : > { %1002 = vmatpush3.msra.mxu0 %v378_v22  ;;  %1037 = vmatpush3.msra.mxu1 %v1566_v29 }
  0x6d   : > { %1003 = vmatprep.subr.mxu0 %v1255_v2  ;;  %1038 = vmatprep.subr.mxu1 %v1255_v2 }
  0x6e   : > { %1004 = vmatpush3.msra.mxu0 %v377_v24  ;;  %1039 = vmatpush3.msra.mxu1 %v1573_v31 }
  0x6f   : > { %1005 = vmatprep.subr.mxu0 %v1255_v2  ;;  %1040 = vmatprep.subr.mxu1 %v1255_v2 }
  0x70   : > { %1006 = vmatpush3.msra.mxu0 %v376_v26  ;;  %1041 = vmatpush3.msra.mxu1 %v392_v34 }
  0x71   : > { %1007 = vmatprep.subr.mxu0 %v1255_v2  ;;  %1042 = vmatprep.subr.mxu1 %v1255_v2 }
  0x72   : > { %1008 = vmatpush3.msra.mxu0 %v375_v28  ;;  %1043 = vmatpush3.msra.mxu1 %v391_v35 }
  0x73   : > { %1009 = vmatprep.subr.mxu0 %v1255_v2  ;;  %1044 = vmatprep.subr.mxu1 %v1255_v2 }
  0x74   : > { %1010 = vmatpush3.msra.mxu0 %v374_v30  ;;  %1045 = vmatpush3.msra.mxu1 %v390_v36 }
  0x75   : > { %1012 = vmatmul.mubr.f32.vlgmr.msra.gmra.mxu0 %v408_v32  ;;  %1049 = vmatprep.subr.mxu0 %v1255_v2 }
  0x76   : > { %1050 = vmatpush3.msra.mxu0 %v1452_v3  ;;  %1081 = vmatprep.mubr.msk.f32.mxu0 %vm1256_vm0, %v1255_v2 }
  0x77   : > { %1051 = vmatprep.subr.mxu0 %v1255_v2  ;;  %1084 = vmatprep.subr.mxu1 %v1255_v2 }
  0x78   : > { %1052 = vmatpush3.msra.mxu0 %v1455_v4 }
  0x79   : > { %1053 = vmatprep.subr.mxu0 %v1255_v2 }
  0x7a   : > { %1054 = vmatpush3.msra.mxu0 %v1460_v5 }
  0x7b   : > { %1055 = vmatprep.subr.mxu0 %v1255_v2 }
  0x7c   : > { %1056 = vmatpush3.msra.mxu0 %v1465_v6 }
  0x7d   : > { %1057 = vmatprep.subr.mxu0 %v1255_v2 }
  0x7e   : > { %1058 = vmatpush3.msra.mxu0 %v1470_v7 }
  0x7f   : > { %1059 = vmatprep.subr.mxu0 %v1255_v2 }
  0x80   : > { %1060 = vmatpush3.msra.mxu0 %v1482_v10 }
  0x81   : > { %1061 = vmatprep.subr.mxu0 %v1255_v2 }
  0x82   : > { %1062 = vmatpush3.msra.mxu0 %v1492_v12 }
  0x83   : > { %1063 = vmatprep.subr.mxu0 %v1255_v2 }
  0x84   : > { %1064 = vmatpush3.msra.mxu0 %v1502_v14 }
  0x85   : > { %1065 = vmatprep.subr.mxu0 %v1255_v2 }
  0x86   : > { %1066 = vmatpush3.msra.mxu0 %v1512_v16 }
  0x87   : > { %1067 = vmatprep.subr.mxu0 %v1255_v2 }
  0x88   : > { %1068 = vmatpush3.msra.mxu0 %v1522_v18 }
  0x89   : > { %1069 = vmatprep.subr.mxu0 %v1255_v2 }
  0x8a   : > { %1070 = vmatpush3.msra.mxu0 %v1532_v20 }
  0x8b   : > { %1071 = vmatprep.subr.mxu0 %v1255_v2 }
  0x8c   : > { %1072 = vmatpush3.msra.mxu0 %v378_v22 }
  0x8d   : > { %1073 = vmatprep.subr.mxu0 %v1255_v2 }
  0x8e   : > { %1074 = vmatpush3.msra.mxu0 %v377_v24 }
  0x8f   : > { %1075 = vmatprep.subr.mxu0 %v1255_v2 }
  0x90   : > { %1076 = vmatpush3.msra.mxu0 %v376_v26 }
  0x91   : > { %1077 = vmatprep.subr.mxu0 %v1255_v2 }
  0x92   : > { %1078 = vmatpush3.msra.mxu0 %v375_v28 }
  0x93   : > { %1079 = vmatprep.subr.mxu0 %v1255_v2 }
  0x94   : > { %1080 = vmatpush3.msra.mxu0 %v374_v30 }
  0x95   : > { %1082 = vmatmul.mubr.f32.vlgmr.msra.gmra.mxu0 %v903_v33 }
 0x135   : > { %v481_v38 = vpop.f32.mrf.mxu0 }
 0x136   : > { %v482_v39 = vadd.f32 %v901_v37, %v481_v38 }
 0x137   : > { %v1013_v40 = vpop.f32.mrf.mxu0 }
 0x138   : > { %v485_v41 = vmax.f32 %v482_v39, 0.0 }
 0x13a   : > { %1047 = vmatmul.mubr.f32.vlgmr.msra.gmra.mxu1 %v485_v41 }
 0x13b   : > { %1085 = vmatpush3.msra.mxu1 %v1473_v8  ;;  %1116 = vmatprep.mubr.msk.f32.mxu1 %vm1256_vm0, %v1255_v2 }
 0x13c   : > { %1086 = vmatprep.subr.mxu1 %v1255_v2 }
 0x13d   : > { %1087 = vmatpush3.msra.mxu1 %v1476_v9 }
 0x13e   : > { %1088 = vmatprep.subr.mxu1 %v1255_v2 }
 0x13f   : > { %1089 = vmatpush3.msra.mxu1 %v1486_v11 }
 0x140   : > { %1090 = vmatprep.subr.mxu1 %v1255_v2 }
 0x141   : > { %1091 = vmatpush3.msra.mxu1 %v1496_v13 }
 0x142   : > { %1092 = vmatprep.subr.mxu1 %v1255_v2 }
 0x143   : > { %1093 = vmatpush3.msra.mxu1 %v1506_v15 }
 0x144   : > { %1094 = vmatprep.subr.mxu1 %v1255_v2 }
 0x145   : > { %1095 = vmatpush3.msra.mxu1 %v1516_v17 }
 0x146   : > { %1096 = vmatprep.subr.mxu1 %v1255_v2 }
 0x147   : > { %1097 = vmatpush3.msra.mxu1 %v1526_v19 }
 0x148   : > { %1098 = vmatprep.subr.mxu1 %v1255_v2 }
 0x149   : > { %1099 = vmatpush3.msra.mxu1 %v1536_v21 }
 0x14a   : > { %1100 = vmatprep.subr.mxu1 %v1255_v2 }
 0x14b   : > { %1101 = vmatpush3.msra.mxu1 %v1544_v23 }
 0x14c   : > { %1102 = vmatprep.subr.mxu1 %v1255_v2 }
 0x14d   : > { %1103 = vmatpush3.msra.mxu1 %v1552_v25 }
 0x14e   : > { %1104 = vmatprep.subr.mxu1 %v1255_v2 }
 0x14f   : > { %1105 = vmatpush3.msra.mxu1 %v1559_v27 }
 0x150   : > { %1106 = vmatprep.subr.mxu1 %v1255_v2 }
 0x151   : > { %1107 = vmatpush3.msra.mxu1 %v1566_v29 }
 0x152   : > { %1108 = vmatprep.subr.mxu1 %v1255_v2 }
 0x153   : > { %1109 = vmatpush3.msra.mxu1 %v1573_v31 }
 0x154   : > { %1110 = vmatprep.subr.mxu1 %v1255_v2 }
 0x155   : > { %v632_v42 = vpop.f32.mrf.mxu0  ;;  %1111 = vmatpush3.msra.mxu1 %v392_v34 }
 0x156   : > { %v633_v43 = vadd.f32 %v901_v37, %v632_v42  ;;  %1112 = vmatprep.subr.mxu1 %v1255_v2 }
 0x157   : > { %v1083_v44 = vpop.f32.mrf.mxu0  ;;  %1113 = vmatpush3.msra.mxu1 %v391_v35 }
 0x158   : > { %v636_v45 = vmax.f32 %v633_v43, 0.0  ;;  %1114 = vmatprep.subr.mxu1 %v1255_v2 }
 0x159   : > { %1115 = vmatpush3.msra.mxu1 %v390_v36 }
 0x15a   : > { %1117 = vmatmul.mubr.f32.vlgmr.msra.gmra.mxu1 %v636_v45 }
 0x1fa   : > { %v558_v47 = vpop.f32.mrf.mxu1 }
 0x1fb   : > { %v559_v48 = vadd.f32 %v902_v46, %v558_v47 }
 0x1fc   : > { %v1048_v49 = vpop.f32.mrf.mxu1 }
 0x1fd   : > { %v562_v50 = vmax.f32 %v559_v48, 0.0 }
 0x1ff   : > { %563 = vst [vmem:[%s367_s12] sm:$0xf] %v562_v50 }
 0x206   : > { %v735_v55 = vld [vmem:[%s367_s12] sm:$0xf] (%p1689_p7) }
 0x207   : > { %736 = vst [vmem:[%s718_s16] sm:$0xf] (%p1689_p7), %v735_v55 }
 0x21a   : > { %v703_v51 = vpop.f32.mrf.mxu1 }
 0x21b   : > { %v704_v52 = vadd.f32 %v902_v46, %v703_v51  ;;  %716 = sbr.rel (!%p1689_p7) target bundleno = 552 (0x228), region = 93 }
 0x21c   : > { %v1118_v53 = vpop.f32.mrf.mxu1 }
 0x21d   : > { %v707_v54 = vmax.f32 %v704_v52, 0.0 }
 0x21f   : > { %904 = vst [vmem:[%s367_s12 + $0x4] sm:$0xf] %v707_v54 }
 0x226   : > { %v737_v56 = vld [vmem:[%s367_s12 + $0x4] sm:$0xf] }
 0x227   : > { %738 = vst [vmem:[%s718_s16 + $0x18] sm:$0xf] %v737_v56 }
 0x228 PF: > { %p18_p2 = scmp.ge.s32.totalorder %s1309_s23, 8   ;;  %s1690_s18 = smov %s1241_s19 }
 0x229   : > { %s1691_s19 = smov %s1245_s20  ;;  %s1692_s20 = smov %s1319_s26 }
 0x22a   : > { %s1693_s21 = smov %s1309_s23  ;;  %20 = sbr.rel (!%p18_p2) target bundleno = 5 (0x5), region = 191 }
 0x22f   :  { %776 = vsyncpa [#allocation4], 1 }
 0x230   :  { %778 = vsyncpa [#allocation4 + $0x1], 1 }
 0x231   :  { %779 = vsyncpa [#allocation6], 1 }
 0x232   :  { %781 = vsyncpa [#allocation6 + $0x1], 1 }

</bundles_post_ra>
